<compile_context>
chip_gen: v5e
topology: v5e:2x2
jax: 0.10.0
libtpu: 0.0.40
codegen_flags: <defaults>
</compile_context>

<pallas_src>
import functools

import jax
import jax.numpy as jnp
from jax.experimental import pallas as pl
from jax.experimental.pallas import tpu as pltpu


def _leaky_relu(x, slope=0.01):
    return jnp.where(x > 0, x, slope * x)


def convenc_kernel(xp_ref, w0_ref, b0_ref, w1_ref, b1_ref, wfc_ref, bout_ref,
                   o_ref, hpad_ref, *, kernel_size, dilation, pad):
    K, d = kernel_size, dilation
    Bt, Tpad, dfp = xp_ref.shape
    T = Tpad - pad
    H = b1_ref.shape[-1]
    n_store = o_ref.shape[-1]
    M = Bt * T

    # ---- layer-0 causal conv (+ residual Linear fused as extra output columns) ----
    # w0_ref[k] is (dfp, 2H): cols [:H] hold conv tap k; cols [H:] hold the residual
    # weight (nonzero only for the current-time tap k = K-1).  K accumulated MXU matmuls
    # over sublane-shifted views of the once-padded input — no tap-stacked HBM stream,
    # no in-kernel concatenate.
    acc0 = jnp.dot(xp_ref[:, 0:T, :].reshape(M, dfp), w0_ref[0],
                   preferred_element_type=jnp.float32)
    for k in range(1, K):
        acc0 = acc0 + jnp.dot(xp_ref[:, k * d:k * d + T, :].reshape(M, dfp), w0_ref[k],
                              preferred_element_type=jnp.float32)
    h = _leaky_relu(acc0[:, :H] + b0_ref[...])
    res = acc0[:, H:]                                # x @ W_res  (bias folded into bout)

    # ---- layer-1 causal conv: stage h into a causal-padded scratch, K accumulated matmuls ----
    if pad > 0:
        hpad_ref[:, :pad, :] = jnp.zeros((Bt, pad, H), jnp.float32)
    hpad_ref[:, pad:pad + T, :] = h.reshape(Bt, T, H)
    acc1 = jnp.dot(hpad_ref[:, 0:T, :].reshape(M, H), w1_ref[0],
                   preferred_element_type=jnp.float32)
    for k in range(1, K):
        acc1 = acc1 + jnp.dot(hpad_ref[:, k * d:k * d + T, :].reshape(M, H), w1_ref[k],
                              preferred_element_type=jnp.float32)
    h2 = _leaky_relu(acc1 + b1_ref[...])

    # ---- fc_musig + residual + combined bias, stored at the (optionally lane-padded) width ----
    out = jnp.dot(h2, wfc_ref[...], preferred_element_type=jnp.float32) + bout_ref[...]
    out = out + jnp.concatenate(
        [res, jnp.zeros((M, n_store - H), jnp.float32)], axis=-1)
    o_ref[...] = out.reshape(Bt, T, n_store)


def _padded_bytes(*shape):
    """f32 bytes of a VMEM buffer after Mosaic layout padding (sublane->8, lane->128)."""
    *lead, s, l = shape
    n = 1
    for v in lead:
        n *= v
    return 4 * n * (-(-s // 8) * 8) * (-(-l // 128) * 128)


def _block_vmem_bytes(bt, T, dfp, H, n_store, pad):
    return (2 * _padded_bytes(bt, pad + T, dfp)      # double-buffered input block
            + 2 * _padded_bytes(bt, T, n_store)      # double-buffered output block
            + _padded_bytes(bt, pad + T, H)          # causal-padded h scratch
            + 6 * _padded_bytes(bt * T, 128))        # live f32 intermediates (acc0,h,res,acc1,h2,out)


def _vmem_budget_and_limit():
    """Per-chip scoped-VMEM sizing: v5e/v6e have 128 MiB physical VMEM, v7x 64 MiB per
    TensorCore.  Request half the physical capacity (capped at 64 MiB) and leave ~8 MiB
    headroom for Mosaic internals when sizing blocks."""
    mib = 1024 * 1024
    try:
        cap = pltpu.get_tpu_info().vmem_capacity_bytes
    except Exception:
        cap = 64 * mib                                # conservative fallback (v7x-sized)
    limit = min(cap // 2, 64 * mib)
    budget = max(limit - 8 * mib, limit // 2)
    return budget, limit


def _pick_batch_tile(B, T, dfp, H, n_store, pad, budget):
    divs = [bt for bt in range(1, B + 1)
            if B % bt == 0 and _block_vmem_bytes(bt, T, dfp, H, n_store, pad) <= budget]
    if not divs:
        # TODO(synk): add T-tiling with a `pad`-row causal halo for shapes where even bt=1
        # exceeds the per-step VMEM budget (needed for very long T, esp. on v7x's 64 MiB/TC).
        return 1
    bt_fit = max(divs)
    # Prefer >=4 grid steps (pipeline overlap of in-DMA / compute / out-DMA; >=2 steps feeds
    # both v7x TensorCores), but don't shrink per-step M = bt*T below ~512 rows if B allows more.
    target_steps = 4 if B >= 4 else min(B, 2)
    capped = [bt for bt in divs if B // bt >= target_steps]
    if not capped:
        return bt_fit
    bt_cap = max(capped)
    if bt_cap * T >= 512 or bt_fit * T < 512:
        return bt_cap
    relaxed = [bt for bt in divs if B // bt >= min(B, 2)]
    return max(relaxed) if relaxed else bt_fit


def convenc_forward(x_ncl, params, *, kernel_size=3, dilation=1, hidden_size=32):
    """x_ncl: (B, d_feat, T) like the PyTorch module. Returns (B, T, 2*hidden)."""
    w0, b0, w1, b1, wres, bres, wfc, bfc = params
    B, d_feat, T = x_ncl.shape
    H, K, dil = hidden_size, kernel_size, dilation
    pad = (K - 1) * dil
    dfp = max(8, -(-d_feat // 8) * 8)                 # input channels padded to a sublane
    n_out = 2 * H
    # Store at the true output width (2H) for realistic shapes (output bytes dominate a
    # mem-bound kernel); only tiny per-call shapes keep a 128-lane-padded (unmasked-vst) store.
    tiny = B * T < 256
    n_store = (-(-n_out // 128) * 128) if (tiny and n_out % 128 != 0) else n_out
    f32 = jnp.float32

    # glue (single transpose + single pad): NCL -> time-major, causal-pad time, zero-pad channels
    x = jnp.transpose(x_ncl, (0, 2, 1)).astype(f32)                     # (B, T, d_feat)
    xp = jnp.pad(x, ((0, 0), (pad, 0), (0, dfp - d_feat)))              # (B, pad+T, dfp)

    # fused layer-0 weight: conv tap k in cols [:H]; residual Linear in cols [H:] of tap K-1
    w0f = jnp.zeros((K, dfp, 2 * H), f32)
    w0f = w0f.at[:, :d_feat, :H].set(w0.astype(f32))
    w0f = w0f.at[K - 1, :d_feat, H:].set(wres.astype(f32))
    w1f = w1.astype(f32)                                                # (K, H, H)
    wfc_p = jnp.zeros((H, n_store), f32).at[:, :n_out].set(wfc.astype(f32))
    bout = jnp.zeros((1, n_store), f32).at[:, :n_out].set(bfc.astype(f32))
    bout = bout.at[:, :H].add(bres.astype(f32))                         # residual bias folded in

    budget, vmem_limit = _vmem_budget_and_limit()
    bt = _pick_batch_tile(B, T, dfp, H, n_store, pad, budget)
    grid = (B // bt,)

    kernel = functools.partial(convenc_kernel, kernel_size=K, dilation=dil, pad=pad)

    cost = pl.CostEstimate(
        flops=2 * B * T * (K * dfp * 2 * H + K * H * H + H * n_store),
        transcendentals=0,
        bytes_accessed=4 * (xp.size + B * T * n_store + w0f.size + w1f.size
                            + wfc_p.size + bout.size + b0.size + b1.size),
    )

    out = pl.pallas_call(
        kernel,
        out_shape=jax.ShapeDtypeStruct((B, T, n_store), f32),
        grid_spec=pltpu.PrefetchScalarGridSpec(
            num_scalar_prefetch=0,
            grid=grid,
            in_specs=[
                pl.BlockSpec((bt, pad + T, dfp), lambda b: (b, 0, 0)),  # once-padded input
                pl.BlockSpec((K, dfp, 2 * H), lambda b: (0, 0, 0)),     # fused conv0 + residual W
                pl.BlockSpec((1, H), lambda b: (0, 0)),                 # conv0 bias
                pl.BlockSpec((K, H, H), lambda b: (0, 0, 0)),           # conv1 taps
                pl.BlockSpec((1, H), lambda b: (0, 0)),                 # conv1 bias
                pl.BlockSpec((H, n_store), lambda b: (0, 0)),           # fc_musig weight
                pl.BlockSpec((1, n_store), lambda b: (0, 0)),           # combined output bias
            ],
            out_specs=pl.BlockSpec((bt, T, n_store), lambda b: (b, 0, 0)),
            scratch_shapes=[pltpu.VMEM((bt, pad + T, H), f32)],
        ),
        compiler_params=pltpu.CompilerParams(
            dimension_semantics=("parallel",),
            vmem_limit_bytes=vmem_limit,
        ),
        cost_estimate=cost,
    )(xp, w0f, b0.astype(f32), w1f, b1.astype(f32), wfc_p, bout)

    return out if n_store == n_out else out[..., :n_out]


# ---------------- deterministic parameter init (xavier uniform, like the module) ----------------
def _xavier_uniform(key, shape, fan_in, fan_out):
    bound = jnp.sqrt(6.0 / (fan_in + fan_out))
    return jax.random.uniform(key, shape, jnp.float32, -bound, bound)


def init_params(key, d_feat=6, hidden_size=32, kernel_size=3):
    H, K = hidden_size, kernel_size
    ks = jax.random.split(key, 8)
    # Conv1d weights in PyTorch are (Cout, Cin, K); we store as (K, Cin, Cout).
    w0_t = _xavier_uniform(ks[0], (H, d_feat, K), fan_in=d_feat * K, fan_out=H * K)
    w0 = jnp.transpose(w0_t, (2, 1, 0))                       # (K, d_feat, H)
    b0 = jax.random.uniform(ks[1], (1, H), jnp.float32, -0.1, 0.1)
    w1_t = _xavier_uniform(ks[2], (H, H, K), fan_in=H * K, fan_out=H * K)
    w1 = jnp.transpose(w1_t, (2, 1, 0))                       # (K, H, H)
    b1 = jax.random.uniform(ks[3], (1, H), jnp.float32, -0.1, 0.1)
    # Linear weights in PyTorch are (out, in); we store transposed (in, out).
    wres = _xavier_uniform(ks[4], (H, d_feat), fan_in=d_feat, fan_out=H).T   # (d_feat, H)
    bres = jax.random.uniform(ks[5], (1, H), jnp.float32, -0.1, 0.1)
    wfc = _xavier_uniform(ks[6], (2 * H, H), fan_in=H, fan_out=2 * H).T      # (H, 2H)
    bfc = jax.random.uniform(ks[7], (1, 2 * H), jnp.float32, -0.1, 0.1)
    return (w0, b0, w1, b1, wres, bres, wfc, bfc)


# ---------------- pure-JAX reference (same semantics as the PyTorch forward) ----------------
def convenc_reference(x_ncl, params, *, kernel_size=3, dilation=1, hidden_size=32):
    w0, b0, w1, b1, wres, bres, wfc, bfc = params
    B, d_feat, T = x_ncl.shape
    H, K = hidden_size, kernel_size
    pad = (K - 1) * dilation
    x = jnp.transpose(x_ncl, (0, 2, 1)).astype(jnp.float32)   # (B, T, d_feat)
    res = x @ wres + bres
    res = jnp.concatenate([res, jnp.zeros((B, T, H), jnp.float32)], axis=-1)

    def conv(h, w, b):
        hp = jnp.pad(h, ((0, 0), (pad, 0), (0, 0)))
        out = jnp.broadcast_to(b, (B, T, w.shape[-1])).astype(jnp.float32)
        for k in range(K):
            out = out + hp[:, k * dilation:k * dilation + T, :] @ w[k]
        return jnp.where(out > 0, out, 0.01 * out)

    h = conv(x, w0, b0)
    h = conv(h, w1, b1)
    return h @ wfc + bfc + res


if __name__ == "__main__":
    key = jax.random.PRNGKey(0)

    def check(B, d_feat, T, H, K, dil, kx, kp):
        x = jax.random.normal(kx, (B, d_feat, T), jnp.float32)   # PyTorch NCL input
        params = init_params(kp, d_feat=d_feat, hidden_size=H, kernel_size=K)
        out = convenc_forward(x, params, kernel_size=K, dilation=dil, hidden_size=H)
        out = jax.block_until_ready(out)
        ref = convenc_reference(x, params, kernel_size=K, dilation=dil, hidden_size=H)
        assert out.shape == (B, T, 2 * H), out.shape
        err = float(jnp.max(jnp.abs(out - ref)))
        assert jnp.allclose(out, ref, atol=1e-4, rtol=1e-4), err

    k1, k2, k3, k4 = jax.random.split(key, 4)
    # module-default tiny shape (exercises the 128-lane-padded store path)
    check(2, 6, 8, 32, 3, 1, k1, k2)
    # larger shape with dilation=2 (exercises the true 64-wide store + multi-step grid path)
    check(8, 6, 64, 32, 3, 2, k3, k4)
    print("KERNEL_OK")
</pallas_src>

<mosaic_0001>
module attributes {stable_mosaic.version = 11 : i64} {
  func.func @convenc_kernel(%arg0: i32, %arg1: memref<1x10x8xf32, #tpu.memory_space<vmem>>, %arg2: memref<3x8x64xf32, #tpu.memory_space<vmem>>, %arg3: memref<1x32xf32, #tpu.memory_space<vmem>>, %arg4: memref<3x32x32xf32, #tpu.memory_space<vmem>>, %arg5: memref<1x32xf32, #tpu.memory_space<vmem>>, %arg6: memref<32x128xf32, #tpu.memory_space<vmem>>, %arg7: memref<1x128xf32, #tpu.memory_space<vmem>>, %arg8: memref<1x8x128xf32, #tpu.memory_space<vmem>>, %arg9: memref<1x10x32xf32, #tpu.memory_space<vmem>>) attributes {dimension_semantics = [#tpu.dimension_semantics<parallel>], iteration_bounds = array<i64: 2>, scalar_prefetch = 0 : i64, scratch_operands = 1 : i64, tpu.core_type = #tpu.core_type<tc>, window_params = [{transform_indices = @transform_0, window_bounds = array<i64: 1, 10, 8>}, {pipeline_mode = #tpu.pipeline_mode<synchronous>, transform_indices = @transform_1, window_bounds = array<i64: 3, 8, 64>}, {pipeline_mode = #tpu.pipeline_mode<synchronous>, transform_indices = @transform_2, window_bounds = array<i64: 1, 32>}, {pipeline_mode = #tpu.pipeline_mode<synchronous>, transform_indices = @transform_3, window_bounds = array<i64: 3, 32, 32>}, {pipeline_mode = #tpu.pipeline_mode<synchronous>, transform_indices = @transform_4, window_bounds = array<i64: 1, 32>}, {pipeline_mode = #tpu.pipeline_mode<synchronous>, transform_indices = @transform_5, window_bounds = array<i64: 32, 128>}, {pipeline_mode = #tpu.pipeline_mode<synchronous>, transform_indices = @transform_6, window_bounds = array<i64: 1, 128>}, {transform_indices = @transform_7, window_bounds = array<i64: 1, 8, 128>}]} {
    %c0 = arith.constant 0 : index
    %c0_0 = arith.constant 0 : index
    %c0_1 = arith.constant 0 : index
    %0 = vector.load %arg1[%c0, %c0_0, %c0_1] : memref<1x10x8xf32, #tpu.memory_space<vmem>>, vector<1x8x8xf32>
    %1 = vector.shape_cast %0 : vector<1x8x8xf32> to vector<8x8xf32>
    %c0_2 = arith.constant 0 : index
    %c0_3 = arith.constant 0 : index
    %c0_4 = arith.constant 0 : index
    %2 = vector.load %arg2[%c0_2, %c0_3, %c0_4] : memref<3x8x64xf32, #tpu.memory_space<vmem>>, vector<1x8x64xf32>
    %3 = vector.shape_cast %2 : vector<1x8x64xf32> to vector<8x64xf32>
    %cst = arith.constant dense<0.000000e+00> : vector<8x64xf32>
    %4 = tpu.matmul %1, %3, %cst {dimension_numbers = #tpu.dot_dimension_numbers<[1], [0], [0], [1], [0, 0, 1, 1], [], []>} : vector<8x8xf32>, vector<8x64xf32>, vector<8x64xf32> -> vector<8x64xf32>
    %c0_5 = arith.constant 0 : index
    %c1 = arith.constant 1 : index
    %c0_6 = arith.constant 0 : index
    %5 = vector.load %arg1[%c0_5, %c1, %c0_6] : memref<1x10x8xf32, #tpu.memory_space<vmem>>, vector<1x8x8xf32>
    %6 = vector.shape_cast %5 : vector<1x8x8xf32> to vector<8x8xf32>
    %c1_7 = arith.constant 1 : index
    %c0_8 = arith.constant 0 : index
    %c0_9 = arith.constant 0 : index
    %7 = vector.load %arg2[%c1_7, %c0_8, %c0_9] : memref<3x8x64xf32, #tpu.memory_space<vmem>>, vector<1x8x64xf32>
    %8 = vector.shape_cast %7 : vector<1x8x64xf32> to vector<8x64xf32>
    %cst_10 = arith.constant dense<0.000000e+00> : vector<8x64xf32>
    %9 = tpu.matmul %6, %8, %cst_10 {dimension_numbers = #tpu.dot_dimension_numbers<[1], [0], [0], [1], [0, 0, 1, 1], [], []>} : vector<8x8xf32>, vector<8x64xf32>, vector<8x64xf32> -> vector<8x64xf32>
    %10 = arith.addf %4, %9 : vector<8x64xf32>
    %c0_11 = arith.constant 0 : index
    %c2 = arith.constant 2 : index
    %c0_12 = arith.constant 0 : index
    %11 = vector.load %arg1[%c0_11, %c2, %c0_12] : memref<1x10x8xf32, #tpu.memory_space<vmem>>, vector<1x8x8xf32>
    %12 = vector.shape_cast %11 : vector<1x8x8xf32> to vector<8x8xf32>
    %c2_13 = arith.constant 2 : index
    %c0_14 = arith.constant 0 : index
    %c0_15 = arith.constant 0 : index
    %13 = vector.load %arg2[%c2_13, %c0_14, %c0_15] : memref<3x8x64xf32, #tpu.memory_space<vmem>>, vector<1x8x64xf32>
    %14 = vector.shape_cast %13 : vector<1x8x64xf32> to vector<8x64xf32>
    %cst_16 = arith.constant dense<0.000000e+00> : vector<8x64xf32>
    %15 = tpu.matmul %12, %14, %cst_16 {dimension_numbers = #tpu.dot_dimension_numbers<[1], [0], [0], [1], [0, 0, 1, 1], [], []>} : vector<8x8xf32>, vector<8x64xf32>, vector<8x64xf32> -> vector<8x64xf32>
    %16 = arith.addf %10, %15 : vector<8x64xf32>
    %17 = vector.extract_strided_slice %16 {offsets = [0, 0], sizes = [8, 32], strides = [1, 1]} : vector<8x64xf32> to vector<8x32xf32>
    %c0_17 = arith.constant 0 : index
    %c0_18 = arith.constant 0 : index
    %18 = vector.load %arg3[%c0_17, %c0_18] : memref<1x32xf32, #tpu.memory_space<vmem>>, vector<1x32xf32>
    %19 = vector.broadcast %18 : vector<1x32xf32> to vector<8x32xf32>
    %20 = arith.addf %17, %19 : vector<8x32xf32>
    %cst_19 = arith.constant 0.000000e+00 : f32
    %21 = vector.broadcast %cst_19 : f32 to vector<8x32xf32>
    %22 = arith.cmpf ogt, %20, %21 : vector<8x32xf32>
    %cst_20 = arith.constant 0.00999999977 : f32
    %23 = vector.broadcast %cst_20 : f32 to vector<8x32xf32>
    %24 = arith.mulf %23, %20 : vector<8x32xf32>
    %25 = arith.select %22, %20, %24 : vector<8x32xi1>, vector<8x32xf32>
    %26 = vector.extract_strided_slice %16 {offsets = [0, 32], sizes = [8, 32], strides = [1, 1]} : vector<8x64xf32> to vector<8x32xf32>
    %cst_21 = arith.constant 0.000000e+00 : f32
    %27 = vector.broadcast %cst_21 : f32 to vector<1x2x32xf32>
    %c0_22 = arith.constant 0 : index
    %c0_23 = arith.constant 0 : index
    %c0_24 = arith.constant 0 : index
    %28 = vector.load %arg9[%c0_22, %c0_23, %c0_24] : memref<1x10x32xf32, #tpu.memory_space<vmem>>, vector<1x2x32xf32>
    tpu.vector_store %arg9[%c0_22, %c0_23, %c0_24], %27 {strides = array<i32>} : memref<1x10x32xf32, #tpu.memory_space<vmem>>, vector<1x2x32xf32>,
    %29 = vector.shape_cast %25 : vector<8x32xf32> to vector<1x8x32xf32>
    %c0_25 = arith.constant 0 : index
    %c2_26 = arith.constant 2 : index
    %c0_27 = arith.constant 0 : index
    %30 = vector.load %arg9[%c0_25, %c2_26, %c0_27] : memref<1x10x32xf32, #tpu.memory_space<vmem>>, vector<1x8x32xf32>
    tpu.vector_store %arg9[%c0_25, %c2_26, %c0_27], %29 {strides = array<i32>} : memref<1x10x32xf32, #tpu.memory_space<vmem>>, vector<1x8x32xf32>,
    %c0_28 = arith.constant 0 : index
    %c0_29 = arith.constant 0 : index
    %c0_30 = arith.constant 0 : index
    %31 = vector.load %arg9[%c0_28, %c0_29, %c0_30] : memref<1x10x32xf32, #tpu.memory_space<vmem>>, vector<1x8x32xf32>
    %32 = vector.shape_cast %31 : vector<1x8x32xf32> to vector<8x32xf32>
    %c0_31 = arith.constant 0 : index
    %c0_32 = arith.constant 0 : index
    %c0_33 = arith.constant 0 : index
    %33 = vector.load %arg4[%c0_31, %c0_32, %c0_33] : memref<3x32x32xf32, #tpu.memory_space<vmem>>, vector<1x32x32xf32>
    %34 = vector.shape_cast %33 : vector<1x32x32xf32> to vector<32x32xf32>
    %cst_34 = arith.constant dense<0.000000e+00> : vector<8x32xf32>
    %35 = tpu.matmul %32, %34, %cst_34 {dimension_numbers = #tpu.dot_dimension_numbers<[1], [0], [0], [1], [0, 0, 1, 1], [], []>} : vector<8x32xf32>, vector<32x32xf32>, vector<8x32xf32> -> vector<8x32xf32>
    %c0_35 = arith.constant 0 : index
    %c1_36 = arith.constant 1 : index
    %c0_37 = arith.constant 0 : index
    %36 = vector.load %arg9[%c0_35, %c1_36, %c0_37] : memref<1x10x32xf32, #tpu.memory_space<vmem>>, vector<1x8x32xf32>
    %37 = vector.shape_cast %36 : vector<1x8x32xf32> to vector<8x32xf32>
    %c1_38 = arith.constant 1 : index
    %c0_39 = arith.constant 0 : index
    %c0_40 = arith.constant 0 : index
    %38 = vector.load %arg4[%c1_38, %c0_39, %c0_40] : memref<3x32x32xf32, #tpu.memory_space<vmem>>, vector<1x32x32xf32>
    %39 = vector.shape_cast %38 : vector<1x32x32xf32> to vector<32x32xf32>
    %cst_41 = arith.constant dense<0.000000e+00> : vector<8x32xf32>
    %40 = tpu.matmul %37, %39, %cst_41 {dimension_numbers = #tpu.dot_dimension_numbers<[1], [0], [0], [1], [0, 0, 1, 1], [], []>} : vector<8x32xf32>, vector<32x32xf32>, vector<8x32xf32> -> vector<8x32xf32>
    %41 = arith.addf %35, %40 : vector<8x32xf32>
    %c0_42 = arith.constant 0 : index
    %c2_43 = arith.constant 2 : index
    %c0_44 = arith.constant 0 : index
    %42 = vector.load %arg9[%c0_42, %c2_43, %c0_44] : memref<1x10x32xf32, #tpu.memory_space<vmem>>, vector<1x8x32xf32>
    %43 = vector.shape_cast %42 : vector<1x8x32xf32> to vector<8x32xf32>
    %c2_45 = arith.constant 2 : index
    %c0_46 = arith.constant 0 : index
    %c0_47 = arith.constant 0 : index
    %44 = vector.load %arg4[%c2_45, %c0_46, %c0_47] : memref<3x32x32xf32, #tpu.memory_space<vmem>>, vector<1x32x32xf32>
    %45 = vector.shape_cast %44 : vector<1x32x32xf32> to vector<32x32xf32>
    %cst_48 = arith.constant dense<0.000000e+00> : vector<8x32xf32>
    %46 = tpu.matmul %43, %45, %cst_48 {dimension_numbers = #tpu.dot_dimension_numbers<[1], [0], [0], [1], [0, 0, 1, 1], [], []>} : vector<8x32xf32>, vector<32x32xf32>, vector<8x32xf32> -> vector<8x32xf32>
    %47 = arith.addf %41, %46 : vector<8x32xf32>
    %c0_49 = arith.constant 0 : index
    %c0_50 = arith.constant 0 : index
    %48 = vector.load %arg5[%c0_49, %c0_50] : memref<1x32xf32, #tpu.memory_space<vmem>>, vector<1x32xf32>
    %49 = vector.broadcast %48 : vector<1x32xf32> to vector<8x32xf32>
    %50 = arith.addf %47, %49 : vector<8x32xf32>
    %cst_51 = arith.constant 0.000000e+00 : f32
    %51 = vector.broadcast %cst_51 : f32 to vector<8x32xf32>
    %52 = arith.cmpf ogt, %50, %51 : vector<8x32xf32>
    %cst_52 = arith.constant 0.00999999977 : f32
    %53 = vector.broadcast %cst_52 : f32 to vector<8x32xf32>
    %54 = arith.mulf %53, %50 : vector<8x32xf32>
    %55 = arith.select %52, %50, %54 : vector<8x32xi1>, vector<8x32xf32>
    %c0_53 = arith.constant 0 : index
    %c0_54 = arith.constant 0 : index
    %56 = vector.load %arg6[%c0_53, %c0_54] : memref<32x128xf32, #tpu.memory_space<vmem>>, vector<32x128xf32>
    %cst_55 = arith.constant dense<0.000000e+00> : vector<8x128xf32>
    %57 = tpu.matmul %55, %56, %cst_55 {dimension_numbers = #tpu.dot_dimension_numbers<[1], [0], [0], [1], [0, 0, 1, 1], [], []>} : vector<8x32xf32>, vector<32x128xf32>, vector<8x128xf32> -> vector<8x128xf32>
    %c0_56 = arith.constant 0 : index
    %c0_57 = arith.constant 0 : index
    %58 = vector.load %arg7[%c0_56, %c0_57] : memref<1x128xf32, #tpu.memory_space<vmem>>, vector<1x128xf32>
    %59 = vector.broadcast %58 : vector<1x128xf32> to vector<8x128xf32>
    %60 = arith.addf %57, %59 : vector<8x128xf32>
    %cst_58 = arith.constant 0.000000e+00 : f32
    %61 = vector.broadcast %cst_58 : f32 to vector<8x96xf32>
    %62 = tpu.concatenate %26, %61 in 1 : vector<8x32xf32>, vector<8x96xf32> -> vector<8x128xf32>
    %63 = arith.addf %60, %62 : vector<8x128xf32>
    %64 = vector.shape_cast %63 : vector<8x128xf32> to vector<1x8x128xf32>
    %c0_59 = arith.constant 0 : index
    %c0_60 = arith.constant 0 : index
    %c0_61 = arith.constant 0 : index
    %65 = vector.load %arg8[%c0_59, %c0_60, %c0_61] : memref<1x8x128xf32, #tpu.memory_space<vmem>>, vector<1x8x128xf32>
    tpu.vector_store %arg8[%c0_59, %c0_60, %c0_61], %64 {strides = array<i32>} : memref<1x8x128xf32, #tpu.memory_space<vmem>>, vector<1x8x128xf32>,
    return
  }
  func.func @transform_0(%arg0: i32) -> (i32, i32, i32) {
    %c0_i32 = arith.constant 0 : i32
    %c0_i32_0 = arith.constant 0 : i32
    %c0_i32_1 = arith.constant 0 : i32
    return %arg0, %c0_i32, %c0_i32_0 : i32, i32, i32
  }
  func.func @transform_1(%arg0: i32) -> (i32, i32, i32) {
    %c0_i32 = arith.constant 0 : i32
    %c0_i32_0 = arith.constant 0 : i32
    %c0_i32_1 = arith.constant 0 : i32
    %c0_i32_2 = arith.constant 0 : i32
    return %c0_i32, %c0_i32_0, %c0_i32_1 : i32, i32, i32
  }
  func.func @transform_2(%arg0: i32) -> (i32, i32) {
    %c0_i32 = arith.constant 0 : i32
    %c0_i32_0 = arith.constant 0 : i32
    %c0_i32_1 = arith.constant 0 : i32
    return %c0_i32, %c0_i32_0 : i32, i32
  }
  func.func @transform_3(%arg0: i32) -> (i32, i32, i32) {
    %c0_i32 = arith.constant 0 : i32
    %c0_i32_0 = arith.constant 0 : i32
    %c0_i32_1 = arith.constant 0 : i32
    %c0_i32_2 = arith.constant 0 : i32
    return %c0_i32, %c0_i32_0, %c0_i32_1 : i32, i32, i32
  }
  func.func @transform_4(%arg0: i32) -> (i32, i32) {
    %c0_i32 = arith.constant 0 : i32
    %c0_i32_0 = arith.constant 0 : i32
    %c0_i32_1 = arith.constant 0 : i32
    return %c0_i32, %c0_i32_0 : i32, i32
  }
  func.func @transform_5(%arg0: i32) -> (i32, i32) {
    %c0_i32 = arith.constant 0 : i32
    %c0_i32_0 = arith.constant 0 : i32
    %c0_i32_1 = arith.constant 0 : i32
    return %c0_i32, %c0_i32_0 : i32, i32
  }
  func.func @transform_6(%arg0: i32) -> (i32, i32) {
    %c0_i32 = arith.constant 0 : i32
    %c0_i32_0 = arith.constant 0 : i32
    %c0_i32_1 = arith.constant 0 : i32
    return %c0_i32, %c0_i32_0 : i32, i32
  }
  func.func @transform_7(%arg0: i32) -> (i32, i32, i32) {
    %c0_i32 = arith.constant 0 : i32
    %c0_i32_0 = arith.constant 0 : i32
    %c0_i32_1 = arith.constant 0 : i32
    return %arg0, %c0_i32, %c0_i32_0 : i32, i32, i32
  }
}

</mosaic_0001>

<bundles_post_ra>
// kernel: tpu_custom_call.1
= control target key start
LH: loop header
LB: loop body
LE: loop exit
PB: predicated region body
PF: predicated region fallthrough
CT: control target
= control target key end

     0   :  { %12 = vsyncpa [#allocation4], 0  ;;  %s1037_s0 = inlined_call_operand.vmem [shape: f32[2,10,8], index: 0, kind: input, shape index: {}]   ;;  %s1038_s1 = inlined_call_operand.hbm [shape: f32[3,8,64], index: 1, kind: input, shape index: {}]   ;;  %s1039_s2 = inlined_call_operand.vmem [shape: f32[1,32], index: 2, kind: input, shape index: {}]   ;;  %s1040_s3 = inlined_call_operand.hbm [shape: f32[3,32,32], index: 3, kind: input, shape index: {}]   ;;  %s1041_s4 = inlined_call_operand.vmem [shape: f32[1,32], index: 4, kind: input, shape index: {}]   ;;  %s1042_s5 = inlined_call_operand.vmem [shape: f32[32,128], index: 5, kind: input, shape index: {}]   ;;  %s1043_s6 = inlined_call_operand.vmem [shape: f32[1,128], index: 6, kind: input, shape index: {}]   ;;  %s1044_s7 = inlined_call_operand.hbm [shape: f32[2,8,128], index: 7, kind: output, shape index: {}]  }
   0x1   :  { %13 = vsyncpa [#allocation7], 0 }
   0x2   :  { %14 = vsyncpa [#allocation5], 0 }
   0x3   :  { %16 = vsyncpa [#allocation5 + $0x1], 0  ;;  %s900_s24 = smov 0   ;;  %s902_s25 = smov 0  }
   0x4   :  { %s904_s26 = smov 0   ;;  %s906_s27 = smov 0  }
   0x5 LB: > { %s921_s28 = sadd.s32 4294967295, %s852_s27   ;;  %s632_s29 = sadd.s32 4294967294, %s852_s27   ;;  %s852_s27 = sphi %s906_s27, %s1051_s27   ;;  %s848_s26 = sphi %s904_s26, %s1050_s26   ;;  %s844_s25 = sphi %s902_s25, %s1049_s25   ;;  %s840_s24 = sphi %s900_s24, %s1048_s24  }
   0x6   : > { %s925_s30 = sadd.s32 1, %s852_s27   ;;  %s181_s8 = sadd.s32 1, %s848_s26 }
   0x7   : > { %s178_s9 = ssub.s32 %s852_s27, %s925_s30  ;;  %p191_p0 = scmp.ne.s32.totalorder %s848_s26, %s844_s25 }
   0x8   : > { %p179_p1 = scmp.eq.s32.totalorder %s178_s9, 0  ;;  %p192_p2 = scmp.eq.s32.totalorder %s921_s28, 1 }
   0x9   : > { %p197_p3 = scmp.ne.s32.totalorder %s844_s25, %s840_s24  ;;  %p198_p4 = scmp.eq.s32.totalorder %s632_s29, 1 }
   0xa   : > { %s936_s10 = scalar_select %p179_p1, %s848_s26, %s181_s8  }
   0xb   : > { %p938_p5 = por %p192_p2, %p191_p0  ;;  %p942_p6 = por %p198_p4, %p197_p3 }
   0xc   : > { %p633_p7 = scmp.ge.s32.totalorder %s852_s27, 1  ;;  %p205_p8 = scmp.lt.s32.totalorder %s852_s27, 3 }
   0xd   : > { %p676_p9 = scmp.eq.s32.totalorder %s921_s28, 0  ;;  %s216_s16 = sshll.u32 %s1038_s1, 4  ;;  %s217_s16 = int_to_ptr.hbm [resolvable:$true] %s216_s16 }
   0xe   : > { %p949_p10 = pnand %p633_p7, %p205_p8  ;;  %s854_s17 = smov [#allocation3]  }
   0xf   : > { %s218_s18 = sshll.u32 %s854_s17, 4  ;;  %s233_s21 = sshll.u32 %s1040_s3, 4  ;;  %s219_s18 = int_to_ptr.vmem [resolvable:$true] %s218_s18  ;;  %s234_s21 = int_to_ptr.hbm [resolvable:$true] %s233_s21 }
  0x10   : > { %p665_p11 = pneg %p949_p10  ;;  %s855_s22 = smov 128  }
  0x11   : > { %s856_s23 = smov 8   ;;  %s857_s29 = smov [#allocation6]  }
  0x12   : > { %p666_p12 = pnand %p676_p9, %p665_p11  ;;  %s235_s8 = sshll.u32 %s857_s29, 4  ;;  %s236_s8 = int_to_ptr.vmem [resolvable:$true] %s235_s8 }
  0x13   : > { %268 = sbr.rel (%p949_p10) target bundleno = 461 (0x1cd), region = 48 }
  0x14   : > { %668 = dma.hbm_to_vmem [thread:$0]  (!%p666_p12), %s217_s16, 384, %s219_s18, [#allocation4], %s855_s22, %s855_s22, %s856_s23  }
  0x15   : > { %671 = dma.hbm_to_vmem [thread:$0]  (!%p666_p12), %s234_s21, 1536, %s236_s8, [#allocation7], %s855_s22, %s855_s22, %s856_s23  }
  0x18   : > { %827 = dma.done.wait (%p676_p9), [#allocation4], 384  }
  0x19   : > { %829 = vsyncadd (%p676_p9), [#allocation4], 4294966912 }
  0x1a   : > { %831 = dma.done.wait (%p676_p9), [#allocation7], 1536  }
  0x1b   : > { %833 = vsyncadd (%p676_p9), [#allocation7], 4294965760  ;;  %p306_p13 = scmp.lt.s32.totalorder %s921_s28, 1  ;;  %vm316_vm0 = vcmask 64512   ;;  %v365_v0 = vld [vmem:[#allocation3 + $0x10] sm:$0xff]  ;;  %v315_v2 = vld [vmem:[#allocation3 + $0x8] sm:$0xff] }
  0x1c   : > { %384 = vmatpush.msra.mxu2 %v365_v0  ;;  %335 = vmatpush.msra.mxu0 %v315_v2  ;;  %v312_v3 = vld [vmem:[#allocation3] sm:$0xff]  ;;  %v412_v6 = vld [vmem:[#allocation6 + $0x38] sm:$0xff]  ;;  %vm398_vm1 = vcmask 254976   ;;  %v411_v9 = vld [vmem:[#allocation6 + $0x30] sm:$0xff]  ;;  %v858_v12 = vmov 0.0   ;;  %s859_s19 = smov 96  }
  0x1d   : > { %s307_s9 = scalar_select %p306_p13, %s921_s28, 1  ;;  %358 = vmatpush.msra.mxu1 %v312_v3  ;;  %v406_v7 = vld [vmem:[#allocation6 + $0x18] sm:$0xff]  ;;  %428 = vmatpush.msra.mxu3 %v412_v6  ;;  %v405_v10 = vld [vmem:[#allocation6 + $0x10] sm:$0xff]  ;;  %399 = vst.msk [vmem:[#allocation2] sm:$0x3] %vm398_vm1, %v858_v12  ;;  %v410_v13 = vld [vmem:[#allocation6 + $0x28] sm:$0xff] }
  0x1e   : > { %v464_v8 = vld [vmem:[#allocation6 + $0x58] sm:$0xff]  ;;  %451 = vmatpush.msrb.mxu0 %v406_v7  ;;  %v463_v11 = vld [vmem:[#allocation6 + $0x50] sm:$0xff]  ;;  %v404_v14 = vld [vmem:[#allocation6 + $0x8] sm:$0xff]  ;;  %vm400_vm3 = vcmask 261120   ;;  %s651_s18 = sshll.u32 %s921_s28, 3 }
  0x1f   : > { %s654_s14 = sshll.u32 %s307_s9, 4  ;;  %480 = vmatpush.msrb.mxu1 %v464_v8  ;;  %429 = vmatpush.msra.mxu3 %v411_v9  ;;  %v462_v15 = vld [vmem:[#allocation6 + $0x48] sm:$0xff]  ;;  %v409_v16 = vld [vmem:[#allocation6 + $0x20] sm:$0xff]  ;;  %v719_v22 = vld [vmem:[%s1039_s2] ss:$0 sm:$0xff]  ;;  %s546_s23 = scalar_lea.hbm %s1044_s7, %s651_s18 }
  0x20   : > { %s310_s16 = scalar_lea.vmem %s1037_s0, %s654_s14  ;;  %452 = vmatpush.msrb.mxu0 %v405_v10  ;;  %v403_v17 = vld [vmem:[#allocation6] sm:$0xff]  ;;  %v500_v31 = vld [vmem:[%s1042_s5 + $0x18] sm:$0xff]  ;;  %v499_v32 = vld [vmem:[%s1042_s5 + $0x10] sm:$0xff]  ;;  %s550_s9 = sshll.u32 %s546_s23, 4  ;;  %s551_s9 = int_to_ptr.hbm [resolvable:$true] %s550_s9 }
  0x21   : > { %v363_v1 = vld [vmem:[%s310_s16 + $0x2] sm:$0xff]  ;;  %481 = vmatpush.msrb.mxu1 %v463_v11  ;;  %430 = vmatpush.msra.mxu3 %v410_v13  ;;  %v720_v38 = vld [vmem:[%s1041_s4] ss:$0 sm:$0xff]  ;;  %s796_s14 = sshra.s32 %s551_s9, 4  ;;  %s797_s14 = int_to_ptr.hbm [resolvable:$true] %s796_s14 }
  0x22   : > { %v313_v4 = vld [vmem:[%s310_s16 + $0x1] sm:$0xff]  ;;  %645 = vmatmul.msk.f32.vlgmr.msra.gmra.mxu2 %vm316_vm0, %v363_v1  ;;  %453 = vmatpush.msrb.mxu0 %v404_v14  ;;  %v721_v44 = vld [vmem:[%s1043_s6] ss:$0 sm:$0xff]  ;;  %s798_s15 = scalar_lea.hbm %s797_s14, 8  ;;  %p803_p3 = scmp.lt.s32.totalorder %s797_s14, %s1044_s7 }
  0x23   : > { %v311_v5 = vld [vmem:[%s310_s16] sm:$0xff]  ;;  %643 = vmatmul.msk.f32.vlgmr.msra.gmra.mxu0 %vm316_vm0, %v313_v4  ;;  %v461_v18 = vld [vmem:[#allocation6 + $0x40] sm:$0xff]  ;;  %482 = vmatpush.msrb.mxu1 %v462_v15  ;;  %s303_s16 = sand.u32 1, %s844_s25   ;;  %p799_p0 = scmp.ne.s32.totalorder %s797_s14, %s798_s15 }
  0x24   : > { %644 = vmatmul.msk.f32.vlgmr.msra.gmra.mxu1 %vm316_vm0, %v311_v5  ;;  %431 = vmatpush.msra.mxu3 %v409_v16  ;;  %v498_v33 = vld [vmem:[%s1042_s5 + $0x8] sm:$0xff]  ;;  %v497_v34 = vld [vmem:[%s1042_s5] sm:$0xff]  ;;  %s640_s17 = sshll.u32 %s303_s16, 3  ;;  %s536_s28 = scalar_lea.sflag [#allocation5], %s303_s16 }
  0x25   : > { %454 = vmatpush.msrb.mxu0 %v403_v17  ;;  %483 = vmatpush.msrb.mxu1 %v461_v18  ;;  %s305_s29 = scalar_lea.vmem [#allocation8], %s640_s17  ;;  %p800_p1 = pnand %p799_p0, %p938_p5 }
  0x26   : > { %520 = vmatpush.msrb.mxu2 %v500_v31  ;;  %s548_s8 = sshll.u32 %s305_s29, 4  ;;  %s802_s17 = scalar_lea.hbm %s1044_s7, 16  ;;  %s549_s8 = int_to_ptr.vmem [resolvable:$true] %s548_s8 }
  0x27   : > { %p801_p2 = pneg %p800_p1  ;;  %p804_p4 = scmp.lt.s32.totalorder %s802_s17, %s798_s15 }
  0x28   : > { %521 = vmatpush.msrb.mxu2 %v499_v32 }
  0x29   : > { %p805_p7 = por %p804_p4, %p803_p3 }
  0x2a   : > { %522 = vmatpush.msrb.mxu2 %v498_v33 }
  0x2b   : > { %p806_p8 = pnand %p805_p7, %p801_p2 }
  0x2c   : > { %523 = vmatpush.msrb.mxu2 %v497_v34 }
  0xa0   : > { %v337_v19 = vpop.f32.mrf.mxu0 }
  0xa1   : > { %v360_v20 = vpop.f32.mrf.mxu1 }
  0xa2   : > { %v361_v21 = vadd.f32 %v360_v20, %v337_v19 }
  0xa5   : > { %v386_v23 = vpop.f32.mrf.mxu2 }
  0xa6   : > { %v389_v24 = vadd.f32 %v386_v23, %v361_v21 }
  0xa8   : > { %v394_v25 = vadd.f32 %v719_v22, %v389_v24  ;;  %529 = vrot.lane.b32.xlu0 %v389_v24, %s859_s19 }
  0xaa   : > { %vm395_vm2 = vcmp.gt.f32.partialorder %v394_v25, 0.0  ;;  %v396_v26 = vmul.f32 0.01, %v394_v25 }
  0xac   : > { %v397_v27 = vsel %vm395_vm2, %v394_v25, %v396_v26 }
  0xad   : > { %401 = vst.msk [vmem:[#allocation2 + $0x2] sm:$0xff] %vm400_vm3, %v397_v27 }
  0xb4   : > { %v407_v28 = vld [vmem:[#allocation2 + $0x1] sm:$0xff] }
  0xb5   : > { %v402_v29 = vld [vmem:[#allocation2] sm:$0xff]  ;;  %646 = vmatmul.msk.f32.vlgmr.msra.gmra.mxu3 %vm400_vm3, %v407_v28 }
  0xb6   : > { %v459_v30 = vld [vmem:[#allocation2 + $0x2] sm:$0xff]  ;;  %647 = vmatmul.msk.f32.vlgmr.msrb.gmra.mxu0 %vm400_vm3, %v402_v29 }
  0xb7   : > { %648 = vmatmul.msk.f32.vlgmr.msrb.gmra.mxu1 %vm400_vm3, %v459_v30 }
 0x11a   : > { %v530_v45 = vpop.permute.xlu0 %529 }
 0x11b   : > { %v532_v48 = vsel %vm400_vm3, %v530_v45, 0.0 }
 0x133   : > { %v456_v35 = vpop.f32.mrf.mxu0 }
 0x134   : > { %v485_v39 = vpop.f32.mrf.mxu1 }
 0x138   : > { %v433_v36 = vpop.f32.mrf.mxu3 }
 0x139   : > { %v457_v37 = vadd.f32 %v456_v35, %v433_v36 }
 0x13b   : > { %v488_v40 = vadd.f32 %v485_v39, %v457_v37 }
 0x13d   : > { %v493_v41 = vadd.f32 %v720_v38, %v488_v40 }
 0x13f   : > { %vm494_vm4 = vcmp.gt.f32.partialorder %v493_v41, 0.0  ;;  %v495_v42 = vmul.f32 0.01, %v493_v41 }
 0x141   : > { %v496_v43 = vsel %vm494_vm4, %v493_v41, %v495_v42 }
 0x142   : > { %649 = vmatmul.msk.f32.vlgmr.msrb.gmra.mxu2 %vm400_vm3, %v496_v43 }
 0x1c5   : > { %v525_v46 = vpop.f32.mrf.mxu2 }
 0x1c6   : > { %v526_v47 = vadd.f32 %v721_v44, %v525_v46 }
 0x1c8   : > { %v533_v49 = vadd.f32 %v532_v48, %v526_v47 }
 0x1ca   : > { %534 = vst [vmem:[%s305_s29] sm:$0xff] %v533_v49 }
 0x1cb   : > { %809 = shalt.err (!%p806_p8)
}
 0x1cc   : > { %663 = dma.vmem_to_hbm [thread:$0]  (%p938_p5), %s549_s8, 128, %s551_s9, %s536_s28  }
 0x1cd PF: > { %p680_p9 = scmp.ge.s32.totalorder %s852_s27, 2  ;;  %s562_s16 = sand.u32 1, %s840_s24  }
 0x1ce   : > { %s563_s21 = scalar_lea.sflag [#allocation5], %s562_s16 }
 0x1cf   : > { %p673_p10 = pnand %p680_p9, %p942_p6 }
 0x1d1   : > { %p674_p11 = pneg %p673_p10 }
 0x1d3   : > { %835 = dma.done.wait (%p674_p11), %s563_s21, 128  }
 0x1d4   : > { %837 = vsyncadd (%p674_p11), %s563_s21, 4294967168  ;;  %p19_p12 = scmp.ge.s32.totalorder %s925_s30, 4   ;;  %s1048_s24 = smov %s844_s25 }
 0x1d5   : > { %s1049_s25 = smov %s848_s26  ;;  %s1050_s26 = smov %s936_s10 }
 0x1d6   : > { %s1051_s27 = smov %s925_s30  ;;  %21 = sbr.rel (!%p19_p12) target bundleno = 5 (0x5), region = 96 }
 0x1db   :  { %569 = vsyncpa [#allocation4], 1 }
 0x1dc   :  { %571 = vsyncpa [#allocation4 + $0x1], 1 }
 0x1dd   :  { %572 = vsyncpa [#allocation7], 1 }
 0x1de   :  { %573 = vsyncpa [#allocation5], 1 }
 0x1df   :  { %575 = vsyncpa [#allocation5 + $0x1], 1 }

</bundles_post_ra>
